<compile_context>
chip_gen: v7x
topology: tpu7x:2x2x1
jax: 0.10.0
libtpu: 0.0.40
codegen_flags: <defaults>
</compile_context>

<pallas_src>
import functools
import math

import jax
import jax.numpy as jnp
from jax.experimental import pallas as pl
from jax.experimental.pallas import tpu as pltpu


CFG = dict(
    vocab=64, hidden=32, heads=2, layers=2, inter=64, max_pos=16, type_vocab=2, num_labels=3
)
LN_EPS = 1e-12
NEG_INF = -1e9
WEIGHT_DTYPE = jnp.bfloat16   # stacked layer weights; accumulation stays f32


# ----------------------------------------------------------------------------
# Fused whole-encoder (+ pooler) Pallas kernel
# ----------------------------------------------------------------------------
def _layernorm(x, g, b, eps=LN_EPS):
    mu = jnp.mean(x, axis=-1, keepdims=True)
    var = jnp.mean(jnp.square(x - mu), axis=-1, keepdims=True)
    return (x - mu) * jax.lax.rsqrt(var + eps) * g + b


def _encoder_kernel(S, H, nh,
                    emb_ref, mask_ref, eg_ref, eb_ref,
                    wqkv_ref, bqkv_ref, wo_ref, bo_ref, g1_ref, b1_ref,
                    wi_ref, bi_ref, wo2_ref, bo2_ref, g2_ref, b2_ref,
                    pw_ref, pb_ref,
                    pooled_ref, x_scr):
    """grid = (batch, layer).  One grid step == one encoder layer of one batch element.

    Activations of the current batch element live in the (S, H) VMEM scratch across the
    layer axis; the only HBM output is the pooled CLS row (written on the last layer).
    """
    layer = pl.program_id(1)
    dh = H // nh
    scale = 1.0 / math.sqrt(dh)
    wdt = wqkv_ref.dtype

    # First layer step of each batch: embedding LayerNorm seeds the resident activations.
    @pl.when(layer == 0)
    def _():
        x_scr[...] = _layernorm(emb_ref[...], eg_ref[...], eb_ref[...])

    x = x_scr[...]                                             # (S, H) f32

    # ---- fused QKV projection: one (S,H) @ (H,3H) GEMM (bf16 operands, f32 acc) ----
    qkv = jnp.dot(x.astype(wdt), wqkv_ref[0],
                  preferred_element_type=jnp.float32) + bqkv_ref[0]      # (S, 3H) f32

    # heads-on-lanes -> heads-on-sublanes: (S, nh*dh) -> (nh*S, dh), row = h*S + s
    def heads(which):
        base = which * H
        return jnp.concatenate(
            [qkv[:, base + h * dh: base + (h + 1) * dh] for h in range(nh)], axis=0)

    qh, kh, vh = heads(0), heads(1), heads(2)                  # (nh*S, dh) each

    # ---- attention: ONE block-diagonal score GEMM + ONE PV GEMM ----
    # mask_ref already combines the key pad mask with the cross-head block-diag mask.
    s = jax.lax.dot_general(qh, kh, (((1,), (1,)), ((), ())),
                            preferred_element_type=jnp.float32) * scale + mask_ref[...]
    s = s - jnp.max(s, axis=-1, keepdims=True)
    p = jnp.exp(s)
    p = p * pl.reciprocal(jnp.sum(p, axis=-1, keepdims=True), approx=True)
    ctx_h = jnp.dot(p, vh, preferred_element_type=jnp.float32)           # (nh*S, dh)

    # heads back onto lanes: (nh*S, dh) -> (S, nh*dh); feeds Wo directly (no VMEM round trip)
    ctx = jnp.concatenate([ctx_h[h * S:(h + 1) * S, :] for h in range(nh)], axis=1)

    # ---- attention output projection + fused residual + LayerNorm ----
    attn_out = jnp.dot(ctx.astype(wdt), wo_ref[0],
                       preferred_element_type=jnp.float32) + bo_ref[0]
    x = _layernorm(attn_out + x, g1_ref[0], b1_ref[0])

    # ---- FFN + fused residual + LayerNorm ----
    inter = jnp.dot(x.astype(wdt), wi_ref[0],
                    preferred_element_type=jnp.float32) + bi_ref[0]
    # TODO(synk): HF/PyTorch BERT uses exact erf-GELU; tanh approximation used here.
    inter = jax.nn.gelu(inter, approximate=True)
    ffn = jnp.dot(inter.astype(wdt), wo2_ref[0],
                  preferred_element_type=jnp.float32) + bo2_ref[0]
    x = _layernorm(ffn + x, g2_ref[0], b2_ref[0])

    x_scr[...] = x

    # ---- last layer: fused CLS pooler; only the pooled (1, H) row ever reaches HBM ----
    @pl.when(layer == pl.num_programs(1) - 1)
    def _():
        cls_tok = x[0:1, :]
        pooled = jnp.tanh(jnp.dot(cls_tok, pw_ref[...],
                                  preferred_element_type=jnp.float32) + pb_ref[...])
        pooled_ref[...] = pooled.reshape(pooled_ref.shape)


def encoder_pooler(emb, score_mask, params, cfg, B, S):
    """emb: (B*S, H) summed embeddings; score_mask: (B*nh*S, nh*S) additive score mask.
    Returns the pooled CLS representation, shape (B, H)."""
    H, nh, L, I = cfg["hidden"], cfg["heads"], cfg["layers"], cfg["inter"]
    nhS = nh * S

    kernel = functools.partial(_encoder_kernel, S, H, nh)

    def const_spec(shape):
        return pl.BlockSpec(shape, lambda b, l: (0,) * len(shape))

    def layer_spec(shape):
        return pl.BlockSpec((1,) + shape, lambda b, l: (l, 0, 0))

    pooled = pl.pallas_call(
        kernel,
        out_shape=jax.ShapeDtypeStruct((B, 1, H), jnp.float32),
        grid=(B, L),
        in_specs=[
            pl.BlockSpec((S, H), lambda b, l: (b, 0)),        # summed embeddings (per batch)
            pl.BlockSpec((nhS, nhS), lambda b, l: (b, 0)),    # block-diag + pad score mask
            const_spec((1, H)), const_spec((1, H)),           # embedding LN gamma / beta
            layer_spec((H, 3 * H)), layer_spec((1, 3 * H)),   # fused QKV W / b
            layer_spec((H, H)), layer_spec((1, H)),           # attn output proj
            layer_spec((1, H)), layer_spec((1, H)),           # attn LN gamma / beta
            layer_spec((H, I)), layer_spec((1, I)),           # FFN in
            layer_spec((I, H)), layer_spec((1, H)),           # FFN out
            layer_spec((1, H)), layer_spec((1, H)),           # output LN gamma / beta
            const_spec((H, H)), const_spec((1, H)),           # pooler W / b
        ],
        out_specs=pl.BlockSpec((1, 1, H), lambda b, l: (b, 0, 0)),
        scratch_shapes=[
            pltpu.VMEM((S, H), jnp.float32),   # per-batch activations resident across layers
        ],
        compiler_params=pltpu.CompilerParams(
            # batches independent -> "parallel" (v7x 2nd TensorCore); layers sequential.
            dimension_semantics=("parallel", "arbitrary")),
    )(emb, score_mask,
      params["emb_ln_g"], params["emb_ln_b"],
      params["wqkv"], params["bqkv"], params["wo"], params["bo"],
      params["ln1_g"], params["ln1_b"],
      params["wi"], params["bi"], params["wo2"], params["bo2"],
      params["ln2_g"], params["ln2_b"],
      params["pooler_w"], params["pooler_b"])
    return pooled.reshape(B, H)


# ----------------------------------------------------------------------------
# Synthetic tiny BERT backbone + classifier head
# ----------------------------------------------------------------------------
def init_params(key, cfg):
    H, I, L = cfg["hidden"], cfg["inter"], cfg["layers"]
    keys = iter(jax.random.split(key, 16))

    def w(shape, dt=jnp.float32):
        return (0.02 * jax.random.normal(next(keys), shape, jnp.float32)).astype(dt)

    return {
        "word_emb": w((cfg["vocab"], H)),
        "pos_emb": w((cfg["max_pos"], H)),
        "type_emb": w((cfg["type_vocab"], H)),
        "emb_ln_g": jnp.ones((1, H), jnp.float32),
        "emb_ln_b": jnp.zeros((1, H), jnp.float32),
        "pooler_w": w((H, H)),
        "pooler_b": jnp.zeros((1, H), jnp.float32),
        "cls_w": w((H, cfg["num_labels"])),
        "cls_b": jnp.zeros((cfg["num_labels"],), jnp.float32),
        # per-layer weights stacked on a leading layer axis (one layer per grid step);
        # matmul weights in bf16 (MXU-native on v6e/v7x), biases / LN params in f32.
        "wqkv": w((L, H, 3 * H), WEIGHT_DTYPE),               # [Wq | Wk | Wv] fused
        "bqkv": jnp.zeros((L, 1, 3 * H), jnp.float32),
        "wo": w((L, H, H), WEIGHT_DTYPE),
        "bo": jnp.zeros((L, 1, H), jnp.float32),
        "ln1_g": jnp.ones((L, 1, H), jnp.float32),
        "ln1_b": jnp.zeros((L, 1, H), jnp.float32),
        "wi": w((L, H, I), WEIGHT_DTYPE),
        "bi": jnp.zeros((L, 1, I), jnp.float32),
        "wo2": w((L, I, H), WEIGHT_DTYPE),
        "bo2": jnp.zeros((L, 1, H), jnp.float32),
        "ln2_g": jnp.ones((L, 1, H), jnp.float32),
        "ln2_b": jnp.zeros((L, 1, H), jnp.float32),
    }


def forward(params, input_ids, attention_mask, labels, cfg):
    B, S = input_ids.shape
    H, nh = cfg["hidden"], cfg["heads"]

    # --- embeddings (gathers = plain-JAX glue) ---
    word = jnp.take(params["word_emb"], input_ids, axis=0)            # (B, S, H)
    pos = params["pos_emb"][:S][None, :, :]                           # (1, S, H)
    typ = params["type_emb"][0][None, None, :]                        # token_type_ids == 0
    emb = (word + pos + typ).reshape(B * S, H)

    # --- additive attention-score mask, built ONCE lane-dense in the wrapper:
    #     key pad mask + cross-head block-diagonal mask.
    #     Rows/cols laid out head-major: index = h*S + s.  Shape (B*nh*S, nh*S). ---
    nhS = nh * S
    head_id = jnp.arange(nhS) // S
    block = jnp.where(head_id[:, None] == head_id[None, :], 0.0, NEG_INF)   # (nhS, nhS)
    pad = (1.0 - attention_mask.astype(jnp.float32)) * NEG_INF              # (B, S)
    pad_keys = jnp.tile(pad, (1, nh))                                       # (B, nhS)
    score_mask = (block[None, :, :] + pad_keys[:, None, :]).reshape(B * nhS, nhS)

    # --- entire encoder (emb LN + all layers) + CLS pooler in ONE fused pallas_call ---
    pooled = encoder_pooler(emb, score_mask, params, cfg, B, S)             # (B, H)

    # --- classifier + cross-entropy in plain JAX (3-lane / scalar outputs: a dedicated
    #     pallas_call would be pure launch overhead with masked stores) ---
    logits = pooled @ params["cls_w"] + params["cls_b"]                     # (B, num_labels)

    loss = None
    if labels is not None:
        logz = jax.nn.log_softmax(logits, axis=-1)
        nll = -jnp.take_along_axis(logz, labels[:, None], axis=1)[:, 0]
        loss = jnp.mean(nll)    # nn.CrossEntropyLoss default 'mean' reduction
    return loss, logits


# ----------------------------------------------------------------------------
if __name__ == "__main__":
    key = jax.random.PRNGKey(0)
    pkey, idkey, lkey = jax.random.split(key, 3)

    params = init_params(pkey, CFG)

    B, S = 2, 8
    input_ids = jax.random.randint(idkey, (B, S), 0, CFG["vocab"], dtype=jnp.int32)
    attention_mask = jnp.array(
        [[1, 1, 1, 1, 1, 1, 1, 1],
         [1, 1, 1, 1, 1, 0, 0, 0]], dtype=jnp.int32
    )
    labels = jax.random.randint(lkey, (B,), 0, CFG["num_labels"], dtype=jnp.int32)

    fwd = jax.jit(functools.partial(forward, cfg=CFG))
    loss, logits = fwd(params, input_ids, attention_mask, labels)
    jax.block_until_ready((loss, logits))

    assert logits.shape == (B, CFG["num_labels"])
    assert loss.shape == ()
    print("KERNEL_OK")
</pallas_src>

<mosaic_0001>
module attributes {stable_mosaic.version = 11 : i64} {
  func.func @_encoder_kernel(%arg0: i32, %arg1: i32, %arg2: memref<8x32xf32, #tpu.memory_space<vmem>>, %arg3: memref<16x16xf32, #tpu.memory_space<vmem>>, %arg4: memref<1x32xf32, #tpu.memory_space<vmem>>, %arg5: memref<1x32xf32, #tpu.memory_space<vmem>>, %arg6: memref<1x32x96xbf16, #tpu.memory_space<vmem>>, %arg7: memref<1x1x96xf32, #tpu.memory_space<vmem>>, %arg8: memref<1x32x32xbf16, #tpu.memory_space<vmem>>, %arg9: memref<1x1x32xf32, #tpu.memory_space<vmem>>, %arg10: memref<1x1x32xf32, #tpu.memory_space<vmem>>, %arg11: memref<1x1x32xf32, #tpu.memory_space<vmem>>, %arg12: memref<1x32x64xbf16, #tpu.memory_space<vmem>>, %arg13: memref<1x1x64xf32, #tpu.memory_space<vmem>>, %arg14: memref<1x64x32xbf16, #tpu.memory_space<vmem>>, %arg15: memref<1x1x32xf32, #tpu.memory_space<vmem>>, %arg16: memref<1x1x32xf32, #tpu.memory_space<vmem>>, %arg17: memref<1x1x32xf32, #tpu.memory_space<vmem>>, %arg18: memref<32x32xf32, #tpu.memory_space<vmem>>, %arg19: memref<1x32xf32, #tpu.memory_space<vmem>>, %arg20: memref<1x1x32xf32, #tpu.memory_space<vmem>>, %arg21: memref<8x32xf32, #tpu.memory_space<vmem>>) attributes {dimension_semantics = [#tpu.dimension_semantics<parallel>, #tpu.dimension_semantics<arbitrary>], iteration_bounds = array<i64: 2, 2>, scalar_prefetch = 0 : i64, scratch_operands = 1 : i64, tpu.core_type = #tpu.core_type<tc>, window_params = [{transform_indices = @transform_0, window_bounds = array<i64: 8, 32>}, {transform_indices = @transform_1, window_bounds = array<i64: 16, 16>}, {pipeline_mode = #tpu.pipeline_mode<synchronous>, transform_indices = @transform_2, window_bounds = array<i64: 1, 32>}, {pipeline_mode = #tpu.pipeline_mode<synchronous>, transform_indices = @transform_3, window_bounds = array<i64: 1, 32>}, {transform_indices = @transform_4, window_bounds = array<i64: 1, 32, 96>}, {transform_indices = @transform_5, window_bounds = array<i64: 1, 1, 96>}, {transform_indices = @transform_6, window_bounds = array<i64: 1, 32, 32>}, {transform_indices = @transform_7, window_bounds = array<i64: 1, 1, 32>}, {transform_indices = @transform_8, window_bounds = array<i64: 1, 1, 32>}, {transform_indices = @transform_9, window_bounds = array<i64: 1, 1, 32>}, {transform_indices = @transform_10, window_bounds = array<i64: 1, 32, 64>}, {transform_indices = @transform_11, window_bounds = array<i64: 1, 1, 64>}, {transform_indices = @transform_12, window_bounds = array<i64: 1, 64, 32>}, {transform_indices = @transform_13, window_bounds = array<i64: 1, 1, 32>}, {transform_indices = @transform_14, window_bounds = array<i64: 1, 1, 32>}, {transform_indices = @transform_15, window_bounds = array<i64: 1, 1, 32>}, {pipeline_mode = #tpu.pipeline_mode<synchronous>, transform_indices = @transform_16, window_bounds = array<i64: 32, 32>}, {pipeline_mode = #tpu.pipeline_mode<synchronous>, transform_indices = @transform_17, window_bounds = array<i64: 1, 32>}, {transform_indices = @transform_18, window_bounds = array<i64: 1, 1, 32>}]} {
    %c0_i32 = arith.constant 0 : i32
    %0 = arith.cmpi eq, %arg1, %c0_i32 : i32
    %1 = arith.extui %0 : i1 to i32
    %c0_i32_0 = arith.constant 0 : i32
    %2 = arith.cmpi ne, %1, %c0_i32_0 : i32
    scf.if %2 {
      %c0_65 = arith.constant 0 : index
      %c0_66 = arith.constant 0 : index
      %135 = vector.load %arg2[%c0_65, %c0_66] : memref<8x32xf32, #tpu.memory_space<vmem>>, vector<8x32xf32>
      %c0_67 = arith.constant 0 : index
      %c0_68 = arith.constant 0 : index
      %136 = vector.load %arg4[%c0_67, %c0_68] : memref<1x32xf32, #tpu.memory_space<vmem>>, vector<1x32xf32>
      %c0_69 = arith.constant 0 : index
      %c0_70 = arith.constant 0 : index
      %137 = vector.load %arg5[%c0_69, %c0_70] : memref<1x32xf32, #tpu.memory_space<vmem>>, vector<1x32xf32>
      %cst_71 = arith.constant dense<0.000000e+00> : vector<8xf32>
      %138 = vector.multi_reduction <add>, %135, %cst_71 [1] : vector<8x32xf32> to vector<8xf32>
      %139 = vector.shape_cast %138 : vector<8xf32> to vector<8x1xf32>
      %cst_72 = arith.constant 3.200000e+01 : f32
      %140 = vector.broadcast %cst_72 : f32 to vector<8x1xf32>
      %141 = arith.divf %139, %140 : vector<8x1xf32>
      %142 = vector.broadcast %141 : vector<8x1xf32> to vector<8x32xf32>
      %143 = arith.subf %135, %142 : vector<8x32xf32>
      %144 = arith.mulf %143, %143 : vector<8x32xf32>
      %cst_73 = arith.constant dense<0.000000e+00> : vector<8xf32>
      %145 = vector.multi_reduction <add>, %144, %cst_73 [1] : vector<8x32xf32> to vector<8xf32>
      %146 = vector.shape_cast %145 : vector<8xf32> to vector<8x1xf32>
      %cst_74 = arith.constant 3.200000e+01 : f32
      %147 = vector.broadcast %cst_74 : f32 to vector<8x1xf32>
      %148 = arith.divf %146, %147 : vector<8x1xf32>
      %149 = vector.broadcast %141 : vector<8x1xf32> to vector<8x32xf32>
      %150 = arith.subf %135, %149 : vector<8x32xf32>
      %cst_75 = arith.constant 9.99999996E-13 : f32
      %151 = vector.broadcast %cst_75 : f32 to vector<8x1xf32>
      %152 = arith.addf %148, %151 : vector<8x1xf32>
      %153 = math.rsqrt %152 : vector<8x1xf32>
      %154 = vector.broadcast %153 : vector<8x1xf32> to vector<8x32xf32>
      %155 = arith.mulf %150, %154 : vector<8x32xf32>
      %156 = vector.broadcast %136 : vector<1x32xf32> to vector<8x32xf32>
      %157 = arith.mulf %155, %156 : vector<8x32xf32>
      %158 = vector.broadcast %137 : vector<1x32xf32> to vector<8x32xf32>
      %159 = arith.addf %157, %158 : vector<8x32xf32>
      %c0_76 = arith.constant 0 : index
      %c0_77 = arith.constant 0 : index
      %160 = vector.load %arg21[%c0_76, %c0_77] : memref<8x32xf32, #tpu.memory_space<vmem>>, vector<8x32xf32>
      tpu.vector_store %arg21[%c0_76, %c0_77], %159 {strides = array<i32>} : memref<8x32xf32, #tpu.memory_space<vmem>>, vector<8x32xf32>,
    } else {
    }
    %c0 = arith.constant 0 : index
    %c0_1 = arith.constant 0 : index
    %3 = vector.load %arg21[%c0, %c0_1] : memref<8x32xf32, #tpu.memory_space<vmem>>, vector<8x32xf32>
    %4 = arith.truncf %3 : vector<8x32xf32> to vector<8x32xbf16>
    %c0_2 = arith.constant 0 : index
    %c0_3 = arith.constant 0 : index
    %c0_4 = arith.constant 0 : index
    %5 = vector.load %arg6[%c0_2, %c0_3, %c0_4] : memref<1x32x96xbf16, #tpu.memory_space<vmem>>, vector<1x32x96xbf16>
    %6 = vector.shape_cast %5 : vector<1x32x96xbf16> to vector<32x96xbf16>
    %cst = arith.constant dense<0.000000e+00> : vector<8x96xf32>
    %7 = tpu.matmul %4, %6, %cst {dimension_numbers = #tpu.dot_dimension_numbers<[1], [0], [0], [1], [0, 0, 1, 1], [], []>} : vector<8x32xbf16>, vector<32x96xbf16>, vector<8x96xf32> -> vector<8x96xf32>
    %c0_5 = arith.constant 0 : index
    %c0_6 = arith.constant 0 : index
    %c0_7 = arith.constant 0 : index
    %8 = vector.load %arg7[%c0_5, %c0_6, %c0_7] : memref<1x1x96xf32, #tpu.memory_space<vmem>>, vector<1x1x96xf32>
    %9 = vector.shape_cast %8 : vector<1x1x96xf32> to vector<1x96xf32>
    %10 = vector.broadcast %9 : vector<1x96xf32> to vector<8x96xf32>
    %11 = arith.addf %7, %10 : vector<8x96xf32>
    %12 = vector.extract_strided_slice %11 {offsets = [0, 0], sizes = [8, 16], strides = [1, 1]} : vector<8x96xf32> to vector<8x16xf32>
    %13 = vector.extract_strided_slice %11 {offsets = [0, 16], sizes = [8, 16], strides = [1, 1]} : vector<8x96xf32> to vector<8x16xf32>
    %14 = tpu.concatenate %12, %13 in 0 : vector<8x16xf32>, vector<8x16xf32> -> vector<16x16xf32>
    %15 = vector.extract_strided_slice %11 {offsets = [0, 32], sizes = [8, 16], strides = [1, 1]} : vector<8x96xf32> to vector<8x16xf32>
    %16 = vector.extract_strided_slice %11 {offsets = [0, 48], sizes = [8, 16], strides = [1, 1]} : vector<8x96xf32> to vector<8x16xf32>
    %17 = tpu.concatenate %15, %16 in 0 : vector<8x16xf32>, vector<8x16xf32> -> vector<16x16xf32>
    %18 = vector.extract_strided_slice %11 {offsets = [0, 64], sizes = [8, 16], strides = [1, 1]} : vector<8x96xf32> to vector<8x16xf32>
    %19 = vector.extract_strided_slice %11 {offsets = [0, 80], sizes = [8, 16], strides = [1, 1]} : vector<8x96xf32> to vector<8x16xf32>
    %20 = tpu.concatenate %18, %19 in 0 : vector<8x16xf32>, vector<8x16xf32> -> vector<16x16xf32>
    %cst_8 = arith.constant dense<0.000000e+00> : vector<16x16xf32>
    %21 = tpu.matmul %14, %17, %cst_8 {dimension_numbers = #tpu.dot_dimension_numbers<[1], [1], [0], [0], [0, 0, 1, 0], [], []>} : vector<16x16xf32>, vector<16x16xf32>, vector<16x16xf32> -> vector<16x16xf32>
    %cst_9 = arith.constant 2.500000e-01 : f32
    %22 = vector.broadcast %cst_9 : f32 to vector<16x16xf32>
    %23 = arith.mulf %21, %22 : vector<16x16xf32>
    %c0_10 = arith.constant 0 : index
    %c0_11 = arith.constant 0 : index
    %24 = vector.load %arg3[%c0_10, %c0_11] : memref<16x16xf32, #tpu.memory_space<vmem>>, vector<16x16xf32>
    %25 = arith.addf %23, %24 : vector<16x16xf32>
    %cst_12 = arith.constant dense<0xFF800000> : vector<16xf32>
    %26 = vector.multi_reduction <maximumf>, %25, %cst_12 [1] : vector<16x16xf32> to vector<16xf32>
    %27 = vector.shape_cast %26 : vector<16xf32> to vector<16x1xf32>
    %28 = vector.broadcast %27 : vector<16x1xf32> to vector<16x16xf32>
    %29 = arith.subf %25, %28 : vector<16x16xf32>
    %30 = math.exp %29 : vector<16x16xf32>
    %cst_13 = arith.constant dense<0.000000e+00> : vector<16xf32>
    %31 = vector.multi_reduction <add>, %30, %cst_13 [1] : vector<16x16xf32> to vector<16xf32>
    %32 = vector.shape_cast %31 : vector<16xf32> to vector<16x1xf32>
    %33 = tpu.reciprocal %32 {approx = true} : vector<16x1xf32> -> vector<16x1xf32>
    %34 = vector.broadcast %33 : vector<16x1xf32> to vector<16x16xf32>
    %35 = arith.mulf %30, %34 : vector<16x16xf32>
    %cst_14 = arith.constant dense<0.000000e+00> : vector<16x16xf32>
    %36 = tpu.matmul %35, %20, %cst_14 {dimension_numbers = #tpu.dot_dimension_numbers<[1], [0], [0], [1], [0, 0, 1, 1], [], []>} : vector<16x16xf32>, vector<16x16xf32>, vector<16x16xf32> -> vector<16x16xf32>
    %37 = vector.extract_strided_slice %36 {offsets = [0, 0], sizes = [8, 16], strides = [1, 1]} : vector<16x16xf32> to vector<8x16xf32>
    %38 = vector.extract_strided_slice %36 {offsets = [8, 0], sizes = [8, 16], strides = [1, 1]} : vector<16x16xf32> to vector<8x16xf32>
    %39 = tpu.concatenate %37, %38 in 1 : vector<8x16xf32>, vector<8x16xf32> -> vector<8x32xf32>
    %40 = arith.truncf %39 : vector<8x32xf32> to vector<8x32xbf16>
    %c0_15 = arith.constant 0 : index
    %c0_16 = arith.constant 0 : index
    %c0_17 = arith.constant 0 : index
    %41 = vector.load %arg8[%c0_15, %c0_16, %c0_17] : memref<1x32x32xbf16, #tpu.memory_space<vmem>>, vector<1x32x32xbf16>
    %42 = vector.shape_cast %41 : vector<1x32x32xbf16> to vector<32x32xbf16>
    %cst_18 = arith.constant dense<0.000000e+00> : vector<8x32xf32>
    %43 = tpu.matmul %40, %42, %cst_18 {dimension_numbers = #tpu.dot_dimension_numbers<[1], [0], [0], [1], [0, 0, 1, 1], [], []>} : vector<8x32xbf16>, vector<32x32xbf16>, vector<8x32xf32> -> vector<8x32xf32>
    %c0_19 = arith.constant 0 : index
    %c0_20 = arith.constant 0 : index
    %c0_21 = arith.constant 0 : index
    %44 = vector.load %arg9[%c0_19, %c0_20, %c0_21] : memref<1x1x32xf32, #tpu.memory_space<vmem>>, vector<1x1x32xf32>
    %45 = vector.shape_cast %44 : vector<1x1x32xf32> to vector<1x32xf32>
    %46 = vector.broadcast %45 : vector<1x32xf32> to vector<8x32xf32>
    %47 = arith.addf %43, %46 : vector<8x32xf32>
    %48 = arith.addf %47, %3 : vector<8x32xf32>
    %c0_22 = arith.constant 0 : index
    %c0_23 = arith.constant 0 : index
    %c0_24 = arith.constant 0 : index
    %49 = vector.load %arg10[%c0_22, %c0_23, %c0_24] : memref<1x1x32xf32, #tpu.memory_space<vmem>>, vector<1x1x32xf32>
    %50 = vector.shape_cast %49 : vector<1x1x32xf32> to vector<1x32xf32>
    %c0_25 = arith.constant 0 : index
    %c0_26 = arith.constant 0 : index
    %c0_27 = arith.constant 0 : index
    %51 = vector.load %arg11[%c0_25, %c0_26, %c0_27] : memref<1x1x32xf32, #tpu.memory_space<vmem>>, vector<1x1x32xf32>
    %52 = vector.shape_cast %51 : vector<1x1x32xf32> to vector<1x32xf32>
    %cst_28 = arith.constant dense<0.000000e+00> : vector<8xf32>
    %53 = vector.multi_reduction <add>, %48, %cst_28 [1] : vector<8x32xf32> to vector<8xf32>
    %54 = vector.shape_cast %53 : vector<8xf32> to vector<8x1xf32>
    %cst_29 = arith.constant 3.200000e+01 : f32
    %55 = vector.broadcast %cst_29 : f32 to vector<8x1xf32>
    %56 = arith.divf %54, %55 : vector<8x1xf32>
    %57 = vector.broadcast %56 : vector<8x1xf32> to vector<8x32xf32>
    %58 = arith.subf %48, %57 : vector<8x32xf32>
    %59 = arith.mulf %58, %58 : vector<8x32xf32>
    %cst_30 = arith.constant dense<0.000000e+00> : vector<8xf32>
    %60 = vector.multi_reduction <add>, %59, %cst_30 [1] : vector<8x32xf32> to vector<8xf32>
    %61 = vector.shape_cast %60 : vector<8xf32> to vector<8x1xf32>
    %cst_31 = arith.constant 3.200000e+01 : f32
    %62 = vector.broadcast %cst_31 : f32 to vector<8x1xf32>
    %63 = arith.divf %61, %62 : vector<8x1xf32>
    %64 = vector.broadcast %56 : vector<8x1xf32> to vector<8x32xf32>
    %65 = arith.subf %48, %64 : vector<8x32xf32>
    %cst_32 = arith.constant 9.99999996E-13 : f32
    %66 = vector.broadcast %cst_32 : f32 to vector<8x1xf32>
    %67 = arith.addf %63, %66 : vector<8x1xf32>
    %68 = math.rsqrt %67 : vector<8x1xf32>
    %69 = vector.broadcast %68 : vector<8x1xf32> to vector<8x32xf32>
    %70 = arith.mulf %65, %69 : vector<8x32xf32>
    %71 = vector.broadcast %50 : vector<1x32xf32> to vector<8x32xf32>
    %72 = arith.mulf %70, %71 : vector<8x32xf32>
    %73 = vector.broadcast %52 : vector<1x32xf32> to vector<8x32xf32>
    %74 = arith.addf %72, %73 : vector<8x32xf32>
    %75 = arith.truncf %74 : vector<8x32xf32> to vector<8x32xbf16>
    %c0_33 = arith.constant 0 : index
    %c0_34 = arith.constant 0 : index
    %c0_35 = arith.constant 0 : index
    %76 = vector.load %arg12[%c0_33, %c0_34, %c0_35] : memref<1x32x64xbf16, #tpu.memory_space<vmem>>, vector<1x32x64xbf16>
    %77 = vector.shape_cast %76 : vector<1x32x64xbf16> to vector<32x64xbf16>
    %cst_36 = arith.constant dense<0.000000e+00> : vector<8x64xf32>
    %78 = tpu.matmul %75, %77, %cst_36 {dimension_numbers = #tpu.dot_dimension_numbers<[1], [0], [0], [1], [0, 0, 1, 1], [], []>} : vector<8x32xbf16>, vector<32x64xbf16>, vector<8x64xf32> -> vector<8x64xf32>
    %c0_37 = arith.constant 0 : index
    %c0_38 = arith.constant 0 : index
    %c0_39 = arith.constant 0 : index
    %79 = vector.load %arg13[%c0_37, %c0_38, %c0_39] : memref<1x1x64xf32, #tpu.memory_space<vmem>>, vector<1x1x64xf32>
    %80 = vector.shape_cast %79 : vector<1x1x64xf32> to vector<1x64xf32>
    %81 = vector.broadcast %80 : vector<1x64xf32> to vector<8x64xf32>
    %82 = arith.addf %78, %81 : vector<8x64xf32>
    %83 = arith.mulf %82, %82 : vector<8x64xf32>
    %84 = arith.mulf %82, %83 : vector<8x64xf32>
    %cst_40 = arith.constant 4.471500e-02 : f32
    %85 = vector.broadcast %cst_40 : f32 to vector<8x64xf32>
    %86 = arith.mulf %85, %84 : vector<8x64xf32>
    %87 = arith.addf %82, %86 : vector<8x64xf32>
    %cst_41 = arith.constant 0.797884583 : f32
    %88 = vector.broadcast %cst_41 : f32 to vector<8x64xf32>
    %89 = arith.mulf %88, %87 : vector<8x64xf32>
    %90 = math.tanh %89 : vector<8x64xf32>
    %cst_42 = arith.constant 1.000000e+00 : f32
    %91 = vector.broadcast %cst_42 : f32 to vector<8x64xf32>
    %92 = arith.addf %91, %90 : vector<8x64xf32>
    %cst_43 = arith.constant 5.000000e-01 : f32
    %93 = vector.broadcast %cst_43 : f32 to vector<8x64xf32>
    %94 = arith.mulf %93, %92 : vector<8x64xf32>
    %95 = arith.mulf %82, %94 : vector<8x64xf32>
    %96 = arith.truncf %95 : vector<8x64xf32> to vector<8x64xbf16>
    %c0_44 = arith.constant 0 : index
    %c0_45 = arith.constant 0 : index
    %c0_46 = arith.constant 0 : index
    %97 = vector.load %arg14[%c0_44, %c0_45, %c0_46] : memref<1x64x32xbf16, #tpu.memory_space<vmem>>, vector<1x64x32xbf16>
    %98 = vector.shape_cast %97 : vector<1x64x32xbf16> to vector<64x32xbf16>
    %cst_47 = arith.constant dense<0.000000e+00> : vector<8x32xf32>
    %99 = tpu.matmul %96, %98, %cst_47 {dimension_numbers = #tpu.dot_dimension_numbers<[1], [0], [0], [1], [0, 0, 1, 1], [], []>} : vector<8x64xbf16>, vector<64x32xbf16>, vector<8x32xf32> -> vector<8x32xf32>
    %c0_48 = arith.constant 0 : index
    %c0_49 = arith.constant 0 : index
    %c0_50 = arith.constant 0 : index
    %100 = vector.load %arg15[%c0_48, %c0_49, %c0_50] : memref<1x1x32xf32, #tpu.memory_space<vmem>>, vector<1x1x32xf32>
    %101 = vector.shape_cast %100 : vector<1x1x32xf32> to vector<1x32xf32>
    %102 = vector.broadcast %101 : vector<1x32xf32> to vector<8x32xf32>
    %103 = arith.addf %99, %102 : vector<8x32xf32>
    %104 = arith.addf %103, %74 : vector<8x32xf32>
    %c0_51 = arith.constant 0 : index
    %c0_52 = arith.constant 0 : index
    %c0_53 = arith.constant 0 : index
    %105 = vector.load %arg16[%c0_51, %c0_52, %c0_53] : memref<1x1x32xf32, #tpu.memory_space<vmem>>, vector<1x1x32xf32>
    %106 = vector.shape_cast %105 : vector<1x1x32xf32> to vector<1x32xf32>
    %c0_54 = arith.constant 0 : index
    %c0_55 = arith.constant 0 : index
    %c0_56 = arith.constant 0 : index
    %107 = vector.load %arg17[%c0_54, %c0_55, %c0_56] : memref<1x1x32xf32, #tpu.memory_space<vmem>>, vector<1x1x32xf32>
    %108 = vector.shape_cast %107 : vector<1x1x32xf32> to vector<1x32xf32>
    %cst_57 = arith.constant dense<0.000000e+00> : vector<8xf32>
    %109 = vector.multi_reduction <add>, %104, %cst_57 [1] : vector<8x32xf32> to vector<8xf32>
    %110 = vector.shape_cast %109 : vector<8xf32> to vector<8x1xf32>
    %cst_58 = arith.constant 3.200000e+01 : f32
    %111 = vector.broadcast %cst_58 : f32 to vector<8x1xf32>
    %112 = arith.divf %110, %111 : vector<8x1xf32>
    %113 = vector.broadcast %112 : vector<8x1xf32> to vector<8x32xf32>
    %114 = arith.subf %104, %113 : vector<8x32xf32>
    %115 = arith.mulf %114, %114 : vector<8x32xf32>
    %cst_59 = arith.constant dense<0.000000e+00> : vector<8xf32>
    %116 = vector.multi_reduction <add>, %115, %cst_59 [1] : vector<8x32xf32> to vector<8xf32>
    %117 = vector.shape_cast %116 : vector<8xf32> to vector<8x1xf32>
    %cst_60 = arith.constant 3.200000e+01 : f32
    %118 = vector.broadcast %cst_60 : f32 to vector<8x1xf32>
    %119 = arith.divf %117, %118 : vector<8x1xf32>
    %120 = vector.broadcast %112 : vector<8x1xf32> to vector<8x32xf32>
    %121 = arith.subf %104, %120 : vector<8x32xf32>
    %cst_61 = arith.constant 9.99999996E-13 : f32
    %122 = vector.broadcast %cst_61 : f32 to vector<8x1xf32>
    %123 = arith.addf %119, %122 : vector<8x1xf32>
    %124 = math.rsqrt %123 : vector<8x1xf32>
    %125 = vector.broadcast %124 : vector<8x1xf32> to vector<8x32xf32>
    %126 = arith.mulf %121, %125 : vector<8x32xf32>
    %127 = vector.broadcast %106 : vector<1x32xf32> to vector<8x32xf32>
    %128 = arith.mulf %126, %127 : vector<8x32xf32>
    %129 = vector.broadcast %108 : vector<1x32xf32> to vector<8x32xf32>
    %130 = arith.addf %128, %129 : vector<8x32xf32>
    %c0_62 = arith.constant 0 : index
    %c0_63 = arith.constant 0 : index
    %131 = vector.load %arg21[%c0_62, %c0_63] : memref<8x32xf32, #tpu.memory_space<vmem>>, vector<8x32xf32>
    tpu.vector_store %arg21[%c0_62, %c0_63], %130 {strides = array<i32>} : memref<8x32xf32, #tpu.memory_space<vmem>>, vector<8x32xf32>,
    %c1_i32 = arith.constant 1 : i32
    %132 = arith.cmpi eq, %arg1, %c1_i32 : i32
    %133 = arith.extui %132 : i1 to i32
    %c0_i32_64 = arith.constant 0 : i32
    %134 = arith.cmpi ne, %133, %c0_i32_64 : i32
    scf.if %134 {
      %135 = vector.extract_strided_slice %130 {offsets = [0, 0], sizes = [1, 32], strides = [1, 1]} : vector<8x32xf32> to vector<1x32xf32>
      %c0_65 = arith.constant 0 : index
      %c0_66 = arith.constant 0 : index
      %136 = vector.load %arg18[%c0_65, %c0_66] : memref<32x32xf32, #tpu.memory_space<vmem>>, vector<32x32xf32>
      %cst_67 = arith.constant dense<0.000000e+00> : vector<1x32xf32>
      %137 = tpu.matmul %135, %136, %cst_67 {dimension_numbers = #tpu.dot_dimension_numbers<[1], [0], [0], [1], [0, 0, 1, 1], [], []>} : vector<1x32xf32>, vector<32x32xf32>, vector<1x32xf32> -> vector<1x32xf32>
      %c0_68 = arith.constant 0 : index
      %c0_69 = arith.constant 0 : index
      %138 = vector.load %arg19[%c0_68, %c0_69] : memref<1x32xf32, #tpu.memory_space<vmem>>, vector<1x32xf32>
      %139 = arith.addf %137, %138 : vector<1x32xf32>
      %140 = math.tanh %139 : vector<1x32xf32>
      %141 = vector.shape_cast %140 : vector<1x32xf32> to vector<1x1x32xf32>
      %c0_70 = arith.constant 0 : index
      %c0_71 = arith.constant 0 : index
      %c0_72 = arith.constant 0 : index
      %142 = vector.load %arg20[%c0_70, %c0_71, %c0_72] : memref<1x1x32xf32, #tpu.memory_space<vmem>>, vector<1x1x32xf32>
      tpu.vector_store %arg20[%c0_70, %c0_71, %c0_72], %141 {strides = array<i32>} : memref<1x1x32xf32, #tpu.memory_space<vmem>>, vector<1x1x32xf32>,
    } else {
    }
    return
  }
  func.func @transform_0(%arg0: i32, %arg1: i32) -> (i32, i32) {
    %c0_i32 = arith.constant 0 : i32
    %c0_i32_0 = arith.constant 0 : i32
    return %arg0, %c0_i32 : i32, i32
  }
  func.func @transform_1(%arg0: i32, %arg1: i32) -> (i32, i32) {
    %c0_i32 = arith.constant 0 : i32
    %c0_i32_0 = arith.constant 0 : i32
    return %arg0, %c0_i32 : i32, i32
  }
  func.func @transform_2(%arg0: i32, %arg1: i32) -> (i32, i32) {
    %c0_i32 = arith.constant 0 : i32
    %c0_i32_0 = arith.constant 0 : i32
    %c0_i32_1 = arith.constant 0 : i32
    return %c0_i32, %c0_i32_0 : i32, i32
  }
  func.func @transform_3(%arg0: i32, %arg1: i32) -> (i32, i32) {
    %c0_i32 = arith.constant 0 : i32
    %c0_i32_0 = arith.constant 0 : i32
    %c0_i32_1 = arith.constant 0 : i32
    return %c0_i32, %c0_i32_0 : i32, i32
  }
  func.func @transform_4(%arg0: i32, %arg1: i32) -> (i32, i32, i32) {
    %c0_i32 = arith.constant 0 : i32
    %c0_i32_0 = arith.constant 0 : i32
    %c0_i32_1 = arith.constant 0 : i32
    return %arg1, %c0_i32, %c0_i32_0 : i32, i32, i32
  }
  func.func @transform_5(%arg0: i32, %arg1: i32) -> (i32, i32, i32) {
    %c0_i32 = arith.constant 0 : i32
    %c0_i32_0 = arith.constant 0 : i32
    %c0_i32_1 = arith.constant 0 : i32
    return %arg1, %c0_i32, %c0_i32_0 : i32, i32, i32
  }
  func.func @transform_6(%arg0: i32, %arg1: i32) -> (i32, i32, i32) {
    %c0_i32 = arith.constant 0 : i32
    %c0_i32_0 = arith.constant 0 : i32
    %c0_i32_1 = arith.constant 0 : i32
    return %arg1, %c0_i32, %c0_i32_0 : i32, i32, i32
  }
  func.func @transform_7(%arg0: i32, %arg1: i32) -> (i32, i32, i32) {
    %c0_i32 = arith.constant 0 : i32
    %c0_i32_0 = arith.constant 0 : i32
    %c0_i32_1 = arith.constant 0 : i32
    return %arg1, %c0_i32, %c0_i32_0 : i32, i32, i32
  }
  func.func @transform_8(%arg0: i32, %arg1: i32) -> (i32, i32, i32) {
    %c0_i32 = arith.constant 0 : i32
    %c0_i32_0 = arith.constant 0 : i32
    %c0_i32_1 = arith.constant 0 : i32
    return %arg1, %c0_i32, %c0_i32_0 : i32, i32, i32
  }
  func.func @transform_9(%arg0: i32, %arg1: i32) -> (i32, i32, i32) {
    %c0_i32 = arith.constant 0 : i32
    %c0_i32_0 = arith.constant 0 : i32
    %c0_i32_1 = arith.constant 0 : i32
    return %arg1, %c0_i32, %c0_i32_0 : i32, i32, i32
  }
  func.func @transform_10(%arg0: i32, %arg1: i32) -> (i32, i32, i32) {
    %c0_i32 = arith.constant 0 : i32
    %c0_i32_0 = arith.constant 0 : i32
    %c0_i32_1 = arith.constant 0 : i32
    return %arg1, %c0_i32, %c0_i32_0 : i32, i32, i32
  }
  func.func @transform_11(%arg0: i32, %arg1: i32) -> (i32, i32, i32) {
    %c0_i32 = arith.constant 0 : i32
    %c0_i32_0 = arith.constant 0 : i32
    %c0_i32_1 = arith.constant 0 : i32
    return %arg1, %c0_i32, %c0_i32_0 : i32, i32, i32
  }
  func.func @transform_12(%arg0: i32, %arg1: i32) -> (i32, i32, i32) {
    %c0_i32 = arith.constant 0 : i32
    %c0_i32_0 = arith.constant 0 : i32
    %c0_i32_1 = arith.constant 0 : i32
    return %arg1, %c0_i32, %c0_i32_0 : i32, i32, i32
  }
  func.func @transform_13(%arg0: i32, %arg1: i32) -> (i32, i32, i32) {
    %c0_i32 = arith.constant 0 : i32
    %c0_i32_0 = arith.constant 0 : i32
    %c0_i32_1 = arith.constant 0 : i32
    return %arg1, %c0_i32, %c0_i32_0 : i32, i32, i32
  }
  func.func @transform_14(%arg0: i32, %arg1: i32) -> (i32, i32, i32) {
    %c0_i32 = arith.constant 0 : i32
    %c0_i32_0 = arith.constant 0 : i32
    %c0_i32_1 = arith.constant 0 : i32
    return %arg1, %c0_i32, %c0_i32_0 : i32, i32, i32
  }
  func.func @transform_15(%arg0: i32, %arg1: i32) -> (i32, i32, i32) {
    %c0_i32 = arith.constant 0 : i32
    %c0_i32_0 = arith.constant 0 : i32
    %c0_i32_1 = arith.constant 0 : i32
    return %arg1, %c0_i32, %c0_i32_0 : i32, i32, i32
  }
  func.func @transform_16(%arg0: i32, %arg1: i32) -> (i32, i32) {
    %c0_i32 = arith.constant 0 : i32
    %c0_i32_0 = arith.constant 0 : i32
    %c0_i32_1 = arith.constant 0 : i32
    return %c0_i32, %c0_i32_0 : i32, i32
  }
  func.func @transform_17(%arg0: i32, %arg1: i32) -> (i32, i32) {
    %c0_i32 = arith.constant 0 : i32
    %c0_i32_0 = arith.constant 0 : i32
    %c0_i32_1 = arith.constant 0 : i32
    return %c0_i32, %c0_i32_0 : i32, i32
  }
  func.func @transform_18(%arg0: i32, %arg1: i32) -> (i32, i32, i32) {
    %c0_i32 = arith.constant 0 : i32
    %c0_i32_0 = arith.constant 0 : i32
    %c0_i32_1 = arith.constant 0 : i32
    return %arg0, %c0_i32, %c0_i32_0 : i32, i32, i32
  }
}

</mosaic_0001>

<bundles_post_ra>
// kernel: forward.1
= control target key start
LH: loop header
LB: loop body
LE: loop exit
PB: predicated region body
PF: predicated region fallthrough
CT: control target
= control target key end

     0   :  { %s2067_s27 = smov 0   ;;  %s2069_s28 = smov 0   ;;  %s2313_s0 = inlined_call_operand.vmem [shape: f32[16,32], index: 0, kind: input, shape index: {}]   ;;  %s2314_s1 = inlined_call_operand.vmem [shape: f32[32,16], index: 1, kind: input, shape index: {}]   ;;  %s2315_s2 = inlined_call_operand.vmem [shape: f32[1,32], index: 2, kind: input, shape index: {}]   ;;  %s2316_s3 = inlined_call_operand.vmem [shape: f32[1,32], index: 3, kind: input, shape index: {}]   ;;  %s2317_s4 = inlined_call_operand.vmem [shape: bf16[2,32,96], index: 4, kind: input, shape index: {}]   ;;  %s2318_s5 = inlined_call_operand.vmem [shape: f32[2,1,96], index: 5, kind: input, shape index: {}]   ;;  %s2319_s6 = inlined_call_operand.vmem [shape: bf16[2,32,32], index: 6, kind: input, shape index: {}]   ;;  %s2320_s7 = inlined_call_operand.vmem [shape: f32[2,1,32], index: 7, kind: input, shape index: {}]   ;;  %s2321_s8 = inlined_call_operand.vmem [shape: f32[2,1,32], index: 8, kind: input, shape index: {}]   ;;  %s2322_s9 = inlined_call_operand.vmem [shape: f32[2,1,32], index: 9, kind: input, shape index: {}]   ;;  %s2323_s10 = inlined_call_operand.vmem [shape: bf16[2,32,64], index: 10, kind: input, shape index: {}]   ;;  %s2324_s11 = inlined_call_operand.vmem [shape: f32[2,1,64], index: 11, kind: input, shape index: {}]   ;;  %s2325_s12 = inlined_call_operand.vmem [shape: bf16[2,64,32], index: 12, kind: input, shape index: {}]   ;;  %s2326_s13 = inlined_call_operand.vmem [shape: f32[2,1,32], index: 13, kind: input, shape index: {}]   ;;  %s2327_s14 = inlined_call_operand.vmem [shape: f32[2,1,32], index: 14, kind: input, shape index: {}]   ;;  %s2328_s15 = inlined_call_operand.vmem [shape: f32[2,1,32], index: 15, kind: input, shape index: {}]   ;;  %s2329_s16 = inlined_call_operand.vmem [shape: f32[32,32], index: 16, kind: input, shape index: {}]   ;;  %s2330_s17 = inlined_call_operand.vmem [shape: f32[1,32], index: 17, kind: input, shape index: {}]   ;;  %s2331_s18 = inlined_call_operand.vmem [shape: f32[2,1,32], index: 18, kind: output, shape index: {}]  }
   0x1   :  { %2339 = sst [smem:[#allocation11_spill]] %s2313_s0  ;;  %s2071_s29 = smov 0  }
   0x2   :  { %2340 = sst [smem:[#allocation12_spill]] %s2314_s1  ;;  %s2073_s30 = smov 0  }
   0x3   :  { %2341 = sst [smem:[#allocation13_spill]] %s2315_s2  ;;  %s2075_s0 = smov 0  }
   0x4   :  { %2342 = sst [smem:[#allocation14_spill]] %s2316_s3 }
   0x5   :  { %2343 = sst [smem:[#allocation15_spill]] %s2317_s4 }
   0x6   :  { %2344 = sst [smem:[#allocation16_spill]] %s2319_s6 }
   0x7   :  { %2345 = sst [smem:[#allocation17_spill]] %s2329_s16 }
   0x8   :  { %2346 = sst [smem:[#allocation18_spill]] %s2330_s17 }
   0x9   :  { %2347 = sst [smem:[#allocation19_spill]] %s2331_s18 }
   0xa LB: > { %2348 = sst [smem:[#allocation3_spill]] %s1953_s29  ;;  %s37_s19 = sadd.s32 1, %s1953_s29  ;;  %s1961_s0 = sphi %s2075_s0, %s28_s0   ;;  %s1957_s30 = sphi %s2073_s30, %s2378_s30   ;;  %s1953_s29 = sphi %s2071_s29, %s2377_s29   ;;  %s1949_s28 = sphi %s2069_s28, %s2376_s28   ;;  %s1945_s27 = sphi %s2067_s27, %s2375_s27  }
   0xb   : > { %2349 = sst [smem:[#allocation4_spill]] %s1957_s30  ;;  %s40_s1 = sadd.s32 1, %s1957_s30 }
   0xc   : > { %2350 = sst [smem:[#allocation5_spill]] %s1961_s0  ;;  %p38_p0 = scmp.ge.s32.totalorder %s37_s19, 2 }
   0xd   : > { %p1681_p1 = scmp.ge.s32.totalorder %s1961_s0, 1  ;;  %p638_p2 = scmp.lt.s32.totalorder %s1961_s0, 5 }
   0xe   : > { %s2380_s19 = smov (%p38_p0, %s37_s19), 0  ;;  %s2382_s1 = smov (!%p38_p0, %s40_s1), %s1957_s30 }
   0xf   : > { %2351 = sst [smem:[#allocation6_spill]] %s2380_s19  ;;  %p639_p3 = pnand %p1681_p1, %p638_p2 }
  0x10   : > { %p42_p4 = scmp.ge.s32.totalorder %s2382_s1, 2 }
  0x11   : > { %642 = sbr.rel (%p639_p3) target bundleno = 3209 (0xc89), region = 92 }
  0x12   : > { %s2384_s1 = smov (%p42_p4, %s2382_s1), 0 }
  0x13   : > { %2352 = sst [smem:[#allocation7_spill]] %s2384_s1 }
  0x18   : > { %p738_p5 = scmp.lt.s32.totalorder %s1949_s28, 1  ;;  %s1683_s20 = sshll.u32 %s1949_s28, 1 }
  0x19   : > { %p743_p6 = scmp.lt.s32.totalorder %s1683_s20, 3  ;;  %p748_p7 = scmp.lt.s32.totalorder %s1945_s27, 1 }
  0x1a   : > { %s2386_s28 = smov (!%p738_p5, %s1949_s28), 1  ;;  %s2355_s26 = sld [smem:[#allocation11_spill]] }
  0x1b   : > { %2353 = sst [smem:[#allocation8_spill]] %s2386_s28  ;;  %s2388_s20 = smov (!%p743_p6, %s1683_s20), 3 }
  0x1c   : > { %s1682_s21 = sshll.u32 %s2386_s28, 3  ;;  %s1684_s19 = sshll.u32 %s2388_s20, 3 }
  0x1d   : > { %s2356_s0 = sld [smem:[#allocation12_spill]]  ;;  %s2358_s4 = sld [smem:[#allocation15_spill]] }
  0x1e   : > { %s2116_s16 = scalar_select %p748_p7, %s1945_s27, 1 }
  0x1f   : > { %s2359_s6 = sld [smem:[#allocation16_spill]]  ;;  %p1693_p8 = scmp.ne.s32.totalorder %s1945_s27, 0 }
  0x20   : > { %s741_s1 = scalar_lea.vmem %s2355_s26, %s1682_s21  ;;  %s1728_s22 = sshll.u32 %s2116_s16, 4  ;;  %vm803_vm0 = vcmask (!%p1693_p8), 261120  }
  0x21   : > { %s785_s21 = scalar_lea.vmem %s2326_s13, %s2116_s16  ;;  %s788_s29 = scalar_lea.vmem %s2327_s14, %s2116_s16  ;;  %v800_v0 = vld [vmem:[%s741_s1] sm:$0xff] (!%p1693_p8) }
  0x22   : > { %s791_s3 = scalar_lea.vmem %s2328_s15, %s2116_s16  ;;  %799 = sbr.rel (%p1693_p8) target bundleno = 348 (0x15c), region = 96  ;;  %v804_v1 = vsel (!%p1693_p8), %vm803_vm0, %v800_v0, 0.0 }
  0x23   : > { %s2113_s17 = scalar_lea.vmem %s2356_s0, %s1684_s19  ;;  %s2126_s0 = scalar_lea.vmem %s2358_s4, %s1728_s22  ;;  %805 = vadd.xlane.f32.xlu0 (!%p1693_p8), %v804_v1 }
  0x24   : > { %2357 = sst [smem:[#allocation9_spill]] %s2113_s17  ;;  %s2148_s4 = scalar_lea.vmem %s2323_s10, %s1728_s22 }
  0x25   : > { %s2131_s25 = scalar_lea.vmem %s2359_s6, %s1728_s22  ;;  %s777_s6 = scalar_lea.vmem %s2324_s11, %s2116_s16 }
  0x26   : > { %2360 = sst [smem:[#allocation10_spill]] %s2131_s25  ;;  %s1731_s25 = sshll.u32 %s2116_s16, 5 }
  0x27   : > { %s2158_s18 = scalar_lea.vmem %s2325_s12, %s1731_s25  ;;  %s2361_s19 = sld [smem:[#allocation13_spill]] (!%p1693_p8) }
  0x28   : > { %s2362_s23 = sld [smem:[#allocation14_spill]] (!%p1693_p8) }
  0x2d   : > { %v1694_v11 = vld [vmem:[%s2361_s19] ss:$0 sm:$0xff] }
  0x2e   : > { %v1695_v13 = vld [vmem:[%s2362_s23] ss:$0 sm:$0xff] }
  0xb0   : > { %v806_v2 = vpop.xlane.xlu0 %805 }
  0xb1   : > { %v808_v3 = vmul.f32 0.03125, %v806_v2 }
  0xb3   : > { %v809_v4 = vsub.f32 %v800_v0, %v808_v3 }
  0xb5   : > { %v810_v5 = vmul.f32 %v809_v4, %v809_v4 }
  0xb7   : > { %v811_v6 = vsel %vm803_vm0, %v810_v5, 0.0 }
  0xb8   : > { %812 = vadd.xlane.f32.xlu0 %v811_v6 }
 0x145   : > { %v813_v7 = vpop.xlane.xlu0 %812 }
 0x146   : > { %v814_v8 = vmul.f32 0.03125, %v813_v7 }
 0x148   : > { %v815_v9 = vadd.f32 1e-12, %v814_v8 }
 0x14a   : > { %1885 = vrsqrt.f32 %v815_v9 }
 0x154   : > { %v1886_v10 = vpop.eup %1885 }
 0x155   : > { %v817_v12 = vmul.f32 %v1886_v10, %v809_v4 }
 0x157   : > { %v824_v14 = vmul.f32 %v1694_v11, %v817_v12 }
 0x159   : > { %v831_v15 = vadd.f32 %v1695_v13, %v824_v14 }
 0x15b   : > { %832 = vst.msk [vmem:[#allocation2] sm:$0xff] %vm803_vm0, %v831_v15 }
 0x15c PF: > { %v1897_v16 = vld [vmem:[%s2126_s0] sm:$0xff]   ;;  %v1963_v17 = vmov 0.0   ;;  %v1898_v18 = vld [vmem:[%s2126_s0 + $0x8] sm:$0xff]   ;;  %vm1964_vm1 = vmmov 0   ;;  %vm858_vm2 = vcmask 261120   ;;  %s2363_s17 = scalar_lea.vmem %s2318_s5, %s2116_s16  ;;  %vm909_vm3 = vcmask 130048   ;;  %s2366_s24 = scalar_lea.vmem %s2320_s7, %s2116_s16 }
 0x15d   : > { %1759 = vmatprep.subr.bf16.mxu1 %v1963_v17  ;;  %1781 = vmatprep.subr.bf16.mxu0 %v1963_v17  ;;  %v1696_v21 = vld [vmem:[%s2363_s17] ss:$0 sm:$0xff]  ;;  %s1965_s28 = smov 112   ;;  %s2364_s20 = sld [smem:[#allocation9_spill]]  ;;  %vm1821_vm4 = vmpackc.low %vm909_vm3, %vm909_vm3  ;;  %vm1327_vm5 = vcmask 523264  }
 0x15e   : > { %1760 = vmatpush3.bf16.msra.mxu1 %v1897_v16  ;;  %1763 = vmatprep.mubr.msk.bf16.mxu1 %vm1964_vm1, %v1963_v17  ;;  %s1966_s22 = smov 96   ;;  %s1967_s30 = smov 64   ;;  %v1706_v6 = vld [vmem:[%s2366_s24] ss:$0 sm:$0xff] }
 0x15f   : > { %1761 = vmatprep.subr.bf16.mxu1 %v1963_v17  ;;  %1785 = vmatprep.mubr.msk.bf16.mxu0 %vm1964_vm1, %v1963_v17  ;;  %s2365_s2 = sld [smem:[#allocation10_spill]]  ;;  %s1968_s25 = smov 16  }
 0x160   : > { %s2367_s0 = scalar_lea.vmem %s2321_s8, %s2116_s16  ;;  %p1724_p9 = scmp.ne.s32.totalorder %s1945_s27, 1 }
 0x161   : > { %s2369_s24 = sld [smem:[#allocation17_spill]] (!%p1724_p9)  ;;  %s2370_s27 = sld [smem:[#allocation8_spill]] (!%p1724_p9)  ;;  %vm1970_vm6 = vmmov (!%p1724_p9), 0   ;;  %vm1485_vm7 = vcmask (!%p1724_p9), 253952  }
 0x162   : > { %v2188_v19 = vld [vmem:[#allocation2] sm:$0xff]  ;;  %1762 = vmatpush3.bf16.msra.mxu1 %v1898_v18 }
 0x163   : > { %v834_v20 = vpack.c.bf16 %v2188_v19, %v2188_v19  ;;  %v995_v35 = vld [vmem:[%s2364_s20] sm:$0xff]  ;;  %v996_v38 = vld [vmem:[%s2364_s20 + $0x8] sm:$0xff]  ;;  %s2368_s20 = scalar_lea.vmem %s2322_s9, %s2116_s16 }
 0x165   : > { %1764 = vmatmul.mubr.msk.bf16.vlgmr.msra.gmra.mrb[0].mxu1 %vm858_vm2, %v834_v20  ;;  %v1899_v63 = vld [vmem:[%s2365_s2] sm:$0xff]   ;;  %v1900_v0 = vld [vmem:[%s2365_s2 + $0x8] sm:$0xff]  }
 0x166   : > { %1782 = vmatpush3.bf16.msra.mxu0 %v1899_v63 }
 0x167   : > { %1783 = vmatprep.subr.bf16.mxu0 %v1963_v17 }
 0x16a   : > { %1784 = vmatpush3.bf16.msra.mxu0 %v1900_v0 }
 0x16b   : > { %1797 = vmatprep.subr.bf16.mxu0 %v1963_v17 }
 0x238   : > { %v896_v22 = vpop.f32.mrb[0].mxu1 }
 0x239   : > { %v897_v23 = vadd.f32 %v1696_v21, %v896_v22  ;;  %v1765_v24 = vpop.f32.mrb[1].mxu1  ;;  %v1901_v21 = vld [vmem:[%s2148_s4] sm:$0xff]   ;;  %v1902_v22 = vld [vmem:[%s2148_s4 + $0x8] sm:$0xff]  }
 0x23a   : > { %v899_v25 = vpop.f32.mrb[2].mxu1 }
 0x23b   : > { %903 = vrot.lane.b32.xlu0 %v897_v23, %s1965_s28  ;;  %v1766_v26 = vpop.f32.mrb[3].mxu1  ;;  %1771 = vmatprep.mubr.msk.f32.mxu1 %vm909_vm3, %v897_v23 }
 0x23c   : > { %v1710_v26 = vld [vmem:[%s2367_s0] ss:$0 sm:$0xff] }
 0x2ad   : > { %v904_v27 = vpop.permute.xlu0 %903 }
 0x2ae   : > { %v1887_v28 = vpack.i.bf16 %v904_v27, %v897_v23 }
 0x2b0   : > { %1888 = vrot.lane.b32.xlu0 %v1887_v28, %s1966_s22 }
 0x322   : > { %v1889_v29 = vpop.permute.xlu0 %1888 }
 0x323   : > { %v1891_v30 = vunpack.i.h.bf16 %v1889_v29  ;;  %v1890_v31 = vunpack.i.l.bf16 %v1889_v29 }
 0x325   : > { %v1820_v32 = vpack.c.bf16 %v1891_v30, %v1890_v31 }
 0x327   : > { %1822 = vmatprep.subr.msk.bf16.mxu1 %vm1821_vm4, %v1820_v32 }
 0x328   : > { %1825 = vmatpush3.bf16.xpose.msk.msra.mxu1 %vm1821_vm4, %v1820_v32  ;;  %v1903_v32 = vld [vmem:[%s2158_s18] sm:$0xff]  }
 0x32f   : > { %1772 = vmatmul.mubr.msk.f32.vlgmr.msra.gmra.mrb[4].mxu1 %vm909_vm3, %v904_v27 }
 0x402   : > { %v1773_v33 = vpop.f32.mrb[4].mxu1 }
 0x403   : > { %v984_v34 = vpop.f32.mrb[5].mxu1  ;;  %v994_v36 = vmul.f32 0.25, %v1773_v33  ;;  %v1904_v33 = vld [vmem:[%s2158_s18 + $0x8] sm:$0xff]  }
 0x404   : > { %v993_v37 = vmul.f32 0.25, %v984_v34  ;;  %v1905_v34 = vld [vmem:[%s2158_s18 + $0x10] sm:$0xff]  }
 0x405   : > { %v998_v41 = vadd.f32 %v996_v38, %v994_v36  ;;  %v1712_v36 = vld [vmem:[%s777_s6] ss:$0 sm:$0xff]  ;;  %s2372_s6 = sld [smem:[#allocation19_spill]] (!%p1724_p9) }
 0x406   : > { %v997_v39 = vadd.f32 %v995_v35, %v993_v37  ;;  %v1906_v35 = vld [vmem:[%s2158_s18 + $0x18] sm:$0xff]  }
 0x407   : > { %v1002_v42 = vsel %vm909_vm3, %v998_v41, -inf }
 0x408   : > { %v999_v40 = vsel %vm909_vm3, %v997_v39, -inf }
 0x409   : > { %1000 = vmax.xlane.f32.xlu1 %v999_v40 }
 0x40b   : > { %s2373_s18 = scalar_lea.vmem (!%p1724_p9), %s2372_s6, %s2370_s27 }
 0x40d   : > { %1003 = vmax.xlane.f32.xlu1 %v1002_v42 }
 0x496   : > { %v1001_v43 = vpop.xlane.xlu1 %1000 }
 0x497   : > { %v1005_v44 = vsub.f32 %v997_v39, %v1001_v43 }
 0x499   : > { %v1007_v45 = vmul.f32 1.442695, %v1005_v44 }
 0x49a   : > { %v1004_v46 = vpop.xlane.xlu1 %1003 }
 0x49b   : > { %1907 = vpow2.f32 %v1007_v45  ;;  %v1006_v47 = vsub.f32 %v998_v41, %v1004_v46 }
 0x49d   : > { %v1009_v48 = vmul.f32 1.442695, %v1006_v47 }
 0x49f   : > { %1909 = vpow2.f32 %v1009_v48 }
 0x4a5   : > { %v1908_v49 = vpop.eup %1907 }
 0x4a6   : > { %v1011_v50 = vsel %vm909_vm3, %v1908_v49, 0.0 }
 0x4a7   : > { %1012 = vadd.xlane.f32.xlu0 %v1011_v50 }
 0x4a9   : > { %v1910_v51 = vpop.eup %1909 }
 0x4aa   : > { %v1014_v52 = vsel %vm909_vm3, %v1910_v51, 0.0 }
 0x4ab   : > { %1015 = vadd.xlane.f32.xlu1 %v1014_v52 }
 0x4bc   : > { %1893 = vrot.lane.b32.xlu1 %v1887_v28, %s1967_s30  ;;  %v1711_v28 = vld [vmem:[%s2368_s20] ss:$0 sm:$0xff]  ;;  %s2371_s20 = sld [smem:[#allocation18_spill]] (!%p1724_p9) }
 0x534   : > { %v1013_v53 = vpop.xlane.xlu0 %1012 }
 0x535   : > { %1911 = vrcp.f32 %v1013_v53 }
 0x538   : > { %v1016_v54 = vpop.xlane.xlu1 %1015 }
 0x539   : > { %1913 = vrcp.f32 %v1016_v54 }
 0x53c   : > { %v1894_v55 = vpop.permute.xlu1 %1893 }
 0x53d   : > { %v1896_v56 = vunpack.i.h.bf16 %v1894_v55  ;;  %v1895_v57 = vunpack.i.l.bf16 %v1894_v55 }
 0x53f   : > { %v1912_v58 = vpop.eup %1911  ;;  %v1826_v59 = vpack.c.bf16 %v1896_v56, %v1895_v57 }
 0x540   : > { %v1019_v60 = vmul.f32 %v1912_v58, %v1908_v49 }
 0x541   : > { %1827 = vmatprep.subr.bf16.mxu1 %v1826_v59 }
 0x542   : > { %1829 = vmatpush3.bf16.msra.mxu1 %v1826_v59  ;;  %1778 = vmatprep.mubr.msk.f32.mxu1 %vm909_vm3, %v1019_v60 }
 0x543   : > { %v1914_v61 = vpop.eup %1913  ;;  %1789 = vmatprep.subr.bf16.mxu1 %v1963_v17 }
 0x544   : > { %v1020_v62 = vmul.f32 %v1914_v61, %v1910_v51  ;;  %v1716_v51 = vld [vmem:[%s785_s21] ss:$0 sm:$0xff] }
 0x546   : > { %1779 = vmatmul.mubr.msk.f32.vlgmr.msra.gmra.mrb[6].mxu1 %vm909_vm3, %v1020_v62 }
 0x547   : > { %1793 = vmatprep.mubr.msk.bf16.mxu1 %vm1964_vm1, %v1963_v17  ;;  %1790 = vmatpush3.bf16.msra.mxu1 %v1901_v21 }
 0x548   : > { %1791 = vmatprep.subr.bf16.mxu1 %v1963_v17 }
 0x54b   : > { %1792 = vmatpush3.bf16.msra.mxu1 %v1902_v22 }
 0x619   : > { %v1780_v1 = vpop.f32.mrb[6].mxu1 }
 0x61a   : > { %1109 = vrot.lane.b32.xlu1 %v1780_v1, %s1968_s25  ;;  %v1099_v2 = vpop.f32.mrb[7].mxu1 }
 0x68c   : > { %v1110_v3 = vpop.permute.xlu1 %1109 }
 0x68d   : > { %v1112_v4 = vsel %vm909_vm3, %v1099_v2, %v1110_v3 }
 0x68e   : > { %v1113_v5 = vpack.c.bf16 %v1112_v4, %v1112_v4  ;;  %v1722_v4 = vld [vmem:[%s788_s29] ss:$0 sm:$0xff] }
 0x690   : > { %1786 = vmatmul.mubr.msk.bf16.vlgmr.msra.gmra.mrb[0].mxu0 %vm858_vm2, %v1113_v5 }
 0x691   : > { %1805 = vmatprep.mubr.msk.bf16.mxu0 %vm1964_vm1, %v1963_v17  ;;  %1798 = vmatpush3.bf16.msra.mxu0 %v1903_v32 }
 0x692   : > { %1799 = vmatprep.subr.bf16.mxu0 %v1963_v17 }
 0x695   : > { %1800 = vmatpush3.bf16.msra.mxu0 %v1904_v33 }
 0x696   : > { %1801 = vmatprep.subr.bf16.mxu0 %v1963_v17 }
 0x699   : > { %1802 = vmatpush3.bf16.msra.mxu0 %v1905_v34 }
 0x69a   : > { %1803 = vmatprep.subr.bf16.mxu0 %v1963_v17 }
 0x69d   : > { %1804 = vmatpush3.bf16.msra.mxu0 %v1906_v35 }
 0x763   : > { %v1174_v7 = vpop.f32.mrb[0].mxu0 }
 0x764   : > { %v1175_v8 = vadd.f32 %v1706_v6, %v1174_v7  ;;  %v1787_v9 = vpop.f32.mrb[1].mxu0  ;;  %v1723_v6 = vld [vmem:[%s791_s3] ss:$0 sm:$0xff] }
 0x765   : > { %v1177_v10 = vpop.f32.mrb[2].mxu0  ;;  %v1406_v9 = vld [vmem:[%s2369_s24] sm:$0xff] (!%p1724_p9) }
 0x766   : > { %v1788_v11 = vpop.f32.mrb[3].mxu0  ;;  %v1180_v12 = vadd.f32 %v1175_v8, %v2188_v19  ;;  %v1407_v10 = vld [vmem:[%s2369_s24 + $0x8] sm:$0xff] (!%p1724_p9) }
 0x767   : > { %v1408_v11 = vld [vmem:[%s2369_s24 + $0x10] sm:$0xff] (!%p1724_p9) }
 0x768   : > { %v1183_v13 = vsel %vm858_vm2, %v1180_v12, 0.0 }
 0x769   : > { %1184 = vadd.xlane.f32.xlu1 %v1183_v13  ;;  %v1831_v13 = vpack.c.bf16 (!%p1724_p9), %v1407_v10, %v1406_v9 }
 0x7f6   : > { %v1185_v14 = vpop.xlane.xlu1 %1184 }
 0x7f7   : > { %v1187_v15 = vmul.f32 0.03125, %v1185_v14  ;;  %v1409_v14 = vld [vmem:[%s2369_s24 + $0x18] sm:$0xff] (!%p1724_p9) }
 0x7f9   : > { %v1188_v16 = vsub.f32 %v1180_v12, %v1187_v15  ;;  %v1969_v12 = vmov (!%p1724_p9), 0.0|0.0   ;;  %v1971_v15 = vmov (!%p1724_p9), 0.0  }
 0x7fa   : > { %1830 = vmatprep.subr.bf16.mxu0 (!%p1724_p9), %v1969_v12 }
 0x7fb   : > { %v1189_v18 = vmul.f32 %v1188_v16, %v1188_v16 }
 0x7fd   : > { %v1190_v20 = vsel %vm858_vm2, %v1189_v18, 0.0  ;;  %v1410_v18 = vld [vmem:[%s2371_s20] sm:$0x1] (!%p1724_p9) }
 0x7fe   : > { %1191 = vadd.xlane.f32.xlu0 %v1190_v20 }
 0x88b   : > { %v1192_v19 = vpop.xlane.xlu0 %1191 }
 0x88c   : > { %v1193_v23 = vmul.f32 0.03125, %v1192_v19 }
 0x88e   : > { %v1194_v24 = vadd.f32 1e-12, %v1193_v23 }
 0x890   : > { %1915 = vrsqrt.f32 %v1194_v24 }
 0x89a   : > { %v1916_v25 = vpop.eup %1915 }
 0x89b   : > { %v1196_v27 = vmul.f32 %v1916_v25, %v1188_v16  ;;  %v1834_v16 = vpack.c.bf16 (!%p1724_p9), %v1409_v14, %v1408_v11 }
 0x89d   : > { %v1203_v29 = vmul.f32 %v1710_v26, %v1196_v27 }
 0x89f   : > { %v1210_v30 = vadd.f32 %v1711_v28, %v1203_v29 }
 0x8a1   : > { %v1211_v31 = vpack.c.bf16 %v1210_v30, %v1210_v30 }
 0x8a3   : > { %1794 = vmatmul.mubr.msk.bf16.vlgmr.msra.gmra.mrb[8].mxu1 %vm858_vm2, %v1211_v31 }
 0x976   : > { %v1272_v37 = vpop.f32.mrb[8].mxu1 }
 0x977   : > { %v1273_v38 = vadd.f32 %v1712_v36, %v1272_v37  ;;  %v1795_v39 = vpop.f32.mrb[9].mxu1 }
 0x978   : > { %v1275_v40 = vpop.f32.mrb[10].mxu1 }
 0x979   : > { %v1278_v41 = vmul.f32 %v1273_v38, %v1273_v38  ;;  %v1796_v42 = vpop.f32.mrb[11].mxu1 }
 0x97b   : > { %v1279_v43 = vmul.f32 %v1278_v41, %v1273_v38 }
 0x97d   : > { %v1280_v44 = vmul.f32 0.044715, %v1279_v43 }
 0x97f   : > { %v1281_v45 = vadd.f32 %v1280_v44, %v1273_v38 }
 0x981   : > { %v1282_v46 = vmul.f32 0.7978846, %v1281_v45 }
 0x983   : > { %1917 = vtanh.f32 %v1282_v46 }
 0x98d   : > { %v1918_v17 = vpop.eup %1917 }
 0x98e   : > { %v1284_v47 = vadd.f32 1.0, %v1918_v17 }
 0x990   : > { %v1285_v48 = vmul.f32 0.5, %v1284_v47 }
 0x992   : > { %v1286_v49 = vmul.f32 %v1285_v48, %v1273_v38 }
 0x994   : > { %v1287_v50 = vpack.c.bf16 %v1286_v49, %v1286_v49 }
 0x996   : > { %1806 = vmatmul.mubr.msk.bf16.vlgmr.msra.gmra.mrb[4].mxu0 %vm1327_vm5, %v1287_v50 }
 0x997   : > { %1817 = vmatprep.mubr.msk.f32.mxu0 (!%p1724_p9), %vm1970_vm6, %v1971_v15  ;;  %1832 = vmatpush3.bf16.msra.mxu0 (!%p1724_p9), %v1831_v13 }
 0x998   : > { %1833 = vmatprep.subr.bf16.mxu0 (!%p1724_p9), %v1969_v12 }
 0x99b   : > { %1835 = vmatpush3.bf16.msra.mxu0 (!%p1724_p9), %v1834_v16 }
 0xa69   : > { %v1365_v52 = vpop.f32.mrb[4].mxu0 }
 0xa6a   : > { %v1366_v53 = vadd.f32 %v1716_v51, %v1365_v52  ;;  %v1807_v54 = vpop.f32.mrb[5].mxu0 }
 0xa6b   : > { %v1368_v55 = vpop.f32.mrb[6].mxu0 }
 0xa6c   : > { %v1808_v56 = vpop.f32.mrb[7].mxu0  ;;  %v1371_v57 = vadd.f32 %v1366_v53, %v1210_v30 }
 0xa6e   : > { %v1374_v58 = vsel %vm858_vm2, %v1371_v57, 0.0 }
 0xa6f   : > { %1375 = vadd.xlane.f32.xlu0 %v1374_v58 }
 0xafc   : > { %v1376_v59 = vpop.xlane.xlu0 %1375 }
 0xafd   : > { %v1377_v60 = vmul.f32 0.03125, %v1376_v59 }
 0xaff   : > { %v1378_v61 = vsub.f32 %v1371_v57, %v1377_v60 }
 0xb01   : > { %v1379_v62 = vmul.f32 %v1378_v61, %v1378_v61 }
 0xb03   : > { %v1380_v63 = vsel %vm858_vm2, %v1379_v62, 0.0 }
 0xb04   : > { %1381 = vadd.xlane.f32.xlu0 %v1380_v63 }
 0xb91   : > { %v1382_v0 = vpop.xlane.xlu0 %1381 }
 0xb92   : > { %v1383_v1 = vmul.f32 0.03125, %v1382_v0 }
 0xb94   : > { %v1384_v2 = vadd.f32 1e-12, %v1383_v1 }
 0xb96   : > { %1919 = vrsqrt.f32 %v1384_v2 }
 0xba0   : > { %v1920_v3 = vpop.eup %1919 }
 0xba1   : > { %v1386_v5 = vmul.f32 %v1920_v3, %v1378_v61  ;;  %1405 = sbr.rel (%p1724_p9) target bundleno = 3209 (0xc89), region = 100 }
 0xba3   : > { %v1393_v7 = vmul.f32 %v1722_v4, %v1386_v5 }
 0xba5   : > { %v1400_v8 = vadd.f32 %v1723_v6, %v1393_v7 }
 0xba7   : > { %1401 = vst.msk [vmem:[#allocation2] sm:$0xff] %vm858_vm2, %v1400_v8  ;;  %1818 = vmatmul.mubr.msk.f32.vlgmr.msra.gmra.mrb[0].mxu0 (!%p1724_p9), %vm858_vm2, %v1400_v8 }
 0xc7a   : > { %v1480_v20 = vpop.f32.mrb[0].mxu0 }
 0xc7b   : > { %v1481_v21 = vadd.f32 %v1480_v20, %v1410_v18  ;;  %v1819_v22 = vpop.f32.mrb[1].mxu0 }
 0xc7d   : > { %1921 = vtanh.f32 %v1481_v21 }
 0xc87   : > { %v1922_v19 = vpop.eup %1921 }
 0xc88   : > { %1486 = vst.msk [vmem:[%s2373_s18] sm:$0x1] %vm1485_vm7, %v1922_v19 }
 0xc89 PF: > { %s2374_s21 = sld [smem:[#allocation5_spill]]  ;;  %s2375_s27 = sld [smem:[#allocation3_spill]] }
 0xc8a   : > { %s2376_s28 = sld [smem:[#allocation4_spill]]  ;;  %s2377_s29 = sld [smem:[#allocation6_spill]] }
 0xc8b   : > { %s2378_s30 = sld [smem:[#allocation7_spill]] }
 0xc8f   : > { %s28_s0 = sadd.s32 1, %s2374_s21  }
 0xc90   : > { %p25_p10 = scmp.ge.s32.totalorder %s28_s0, 6  }
 0xc92   :  { %27 = sbr.rel (!%p25_p10) target bundleno = 10 (0xa), region = 169 }

</bundles_post_ra>
